<compile_context>
chip_gen: v7x
topology: tpu7x:2x2x1
jax: 0.10.0
libtpu: 0.0.40
codegen_flags: <defaults>
</compile_context>

<pallas_src>
import jax
import jax.numpy as jnp
from jax.experimental import pallas as pl
from jax.experimental.pallas import tpu as pltpu


def _round_up(x, m):
    return -(-x // m) * m


def _device_kind():
    try:
        return jax.devices()[0].device_kind.lower()
    except Exception:
        return ""


def _num_tensorcores():
    # v7x has 2 TensorCores per chip; a "parallel" grid axis shards across them.
    return 2 if "v7" in _device_kind() else 1


def _epilogue_dtype():
    # v5e and earlier have no bf16 VPU/EUP: keep bias/ReLU epilogues in f32 there.
    kind = _device_kind()
    if any(v in kind for v in ("v2", "v3", "v4", "v5")):
        return jnp.float32
    return jnp.bfloat16


def _choose_tile(n, max_tile=1024, num_cores=1):
    """Batch tile: big enough to amortize per-grid-step overhead, small enough
    to keep >= num_cores blocks (v7x megacore), 128-multiples for large n,
    exact-fit single block for small n (block == full dim is always legal)."""
    if n <= max_tile and (num_cores == 1 or n < 2 * 128):
        return n
    per_core = pl.cdiv(n, num_cores)
    return max(128, min(max_tile, _round_up(per_core, 128)))


# ----------------------------------------------------------------------------
# Pallas kernel: fused  tanh( relu( relu(x@W1+b1) @ W2 + b2 ) @ W3 + b3 )
# ----------------------------------------------------------------------------
def _policy_kernel(x_ref, w1_ref, b1_ref, w2_ref, b2_ref, w3_ref, b3_ref, o_ref):
    # In-kernel f32 -> bf16 cast of x (free VPU work, hidden under DMA/MXU).
    x = x_ref[...].astype(jnp.bfloat16)                      # (TILE, d)
    epi = b1_ref.dtype   # bf16 on v6e/v7x, f32 on v5e and older

    # layer 1: MXU bf16 with f32 accumulation; epilogue in `epi`
    h1 = jnp.dot(x, w1_ref[...], preferred_element_type=jnp.float32)
    h1 = jnp.maximum(h1.astype(epi) + b1_ref[...], 0).astype(jnp.bfloat16)

    # layer 2
    h2 = jnp.dot(h1, w2_ref[...], preferred_element_type=jnp.float32)
    h2 = jnp.maximum(h2.astype(epi) + b2_ref[...], 0).astype(jnp.bfloat16)

    # layer 3 + tanh (EUP, f32); store only the valid a_dim columns
    a = jnp.dot(h2, w3_ref[...], preferred_element_type=jnp.float32) + b3_ref[...]
    out = jnp.tanh(a)                                         # (TILE, a_pad) f32
    o_ref[...] = out[:, : o_ref.shape[1]].astype(o_ref.dtype)  # (TILE, a_dim)


# ----------------------------------------------------------------------------
# Wrapper around pallas_call: flat (N, o_dim) -> (N, a_dim), no wrapper copies
# ----------------------------------------------------------------------------
def _policy_mlp(x, kp, *, max_tile=1024):
    n, d = x.shape
    h_pad = kp["w1"].shape[1]
    a_pad = kp["w3"].shape[1]
    a_dim = kp["a_dim"]

    tile = _choose_tile(n, max_tile=max_tile, num_cores=_num_tensorcores())
    grid = (pl.cdiv(n, tile),)            # ragged last block handled by Pallas

    flops = 2 * n * (d * h_pad + h_pad * h_pad + h_pad * a_pad)
    bytes_accessed = (
        n * d * x.dtype.itemsize                                    # x (f32)
        + (kp["w1"].size + kp["w2"].size + kp["w3"].size) * 2       # weights bf16
        + (kp["b1"].size + kp["b2"].size) * kp["b1"].dtype.itemsize # b1, b2
        + kp["b3"].size * 4                                         # b3 (f32)
        + n * a_dim * 4                                             # output (f32)
    )
    cost = pl.CostEstimate(flops=int(flops),
                           transcendentals=int(n * a_pad),
                           bytes_accessed=int(bytes_accessed))

    out = pl.pallas_call(
        _policy_kernel,
        out_shape=jax.ShapeDtypeStruct((n, a_dim), jnp.float32),
        grid_spec=pltpu.PrefetchScalarGridSpec(
            num_scalar_prefetch=0,
            grid=grid,
            in_specs=[
                pl.BlockSpec((tile, d), lambda i: (i, 0)),       # x tile (f32)
                pl.BlockSpec((d, h_pad), lambda i: (0, 0)),      # W1 (bf16, full)
                pl.BlockSpec((1, h_pad), lambda i: (0, 0)),      # b1
                pl.BlockSpec((h_pad, h_pad), lambda i: (0, 0)),  # W2 (bf16, full)
                pl.BlockSpec((1, h_pad), lambda i: (0, 0)),      # b2
                pl.BlockSpec((h_pad, a_pad), lambda i: (0, 0)),  # W3 (bf16, full)
                pl.BlockSpec((1, a_pad), lambda i: (0, 0)),      # b3 (f32)
            ],
            out_specs=pl.BlockSpec((tile, a_dim), lambda i: (i, 0)),  # a_dim wide
        ),
        compiler_params=pltpu.CompilerParams(
            dimension_semantics=("parallel",)),
        cost_estimate=cost,
    )(x, kp["w1"], kp["b1"], kp["w2"], kp["b2"], kp["w3"], kp["b3"])

    return out   # already (n, a_dim): no post-kernel slice


# ----------------------------------------------------------------------------
# Parameters (PyTorch nn.Linear-style init) + kernel-ready padded params
# ----------------------------------------------------------------------------
def init_policy_params(key, o_dim, a_dim, h_size=256, dtype=jnp.float32):
    """Uniform(+/- 1/sqrt(fan_in)) init, like torch.nn.Linear's default."""
    ks = jax.random.split(key, 6)

    def linear(kw, kb, fan_in, fan_out):
        bound = 1.0 / (fan_in ** 0.5)
        w = jax.random.uniform(kw, (fan_in, fan_out), dtype, -bound, bound)
        b = jax.random.uniform(kb, (fan_out,), dtype, -bound, bound)
        return w, b

    w1, b1 = linear(ks[0], ks[1], o_dim, h_size)
    w2, b2 = linear(ks[2], ks[3], h_size, h_size)
    w3, b3 = linear(ks[4], ks[5], h_size, a_dim)
    return (w1, b1, w2, b2, w3, b3)


def prepare_kernel_params(raw_params, epilogue_dtype=None):
    """Pad hidden/action dims to 128-lane multiples (once), cast weights to
    bf16 for the MXU, and store layer-1/2 biases in the epilogue dtype
    (bf16 on v6e/v7x, f32 on v5e). Padded bias entries stay exactly zero."""
    w1, b1, w2, b2, w3, b3 = raw_params
    if epilogue_dtype is None:
        epilogue_dtype = _epilogue_dtype()
    o_dim, h = w1.shape
    a_dim = w3.shape[1]
    h_pad = _round_up(h, 128)
    a_pad = _round_up(a_dim, 128)

    def pad_w(w, rows, cols):
        out = jnp.zeros((rows, cols), jnp.bfloat16)
        return out.at[: w.shape[0], : w.shape[1]].set(w.astype(jnp.bfloat16))

    def pad_b(b, cols, dt):
        out = jnp.zeros((1, cols), dt)
        return out.at[0, : b.shape[0]].set(b.astype(dt))

    return dict(
        w1=pad_w(w1, o_dim, h_pad), b1=pad_b(b1, h_pad, epilogue_dtype),
        w2=pad_w(w2, h_pad, h_pad), b2=pad_b(b2, h_pad, epilogue_dtype),
        w3=pad_w(w3, h_pad, a_pad), b3=pad_b(b3, a_pad, jnp.float32),
        a_dim=a_dim,
    )


# ----------------------------------------------------------------------------
# Forward (reproduces Policy.forward incl. extend_and_repeat semantics)
# ----------------------------------------------------------------------------
def policy_forward(kernel_params, o_input, repeat=None, *, max_tile=1024):
    if repeat is not None:
        # extend_and_repeat(o_input, 1, repeat) makes `repeat` identical copies
        # along dim 1: compute the MLP once per unique observation and
        # broadcast the result (any input rank), instead of repeating the
        # FLOPs/HBM traffic `repeat` times.
        act = policy_forward(kernel_params, o_input, max_tile=max_tile)
        act = jnp.expand_dims(act, 1)
        shape = list(act.shape)
        shape[1] = repeat
        return jnp.broadcast_to(act, tuple(shape))

    lead = o_input.shape[:-1]
    x = o_input.reshape(-1, o_input.shape[-1])
    act = _policy_mlp(x, kernel_params, max_tile=max_tile)
    return act.reshape(*lead, act.shape[-1])


# ----------------------------------------------------------------------------
# Plain-JAX reference (f32) for sanity checking
# ----------------------------------------------------------------------------
def policy_forward_ref(raw_params, o_input, repeat=None):
    w1, b1, w2, b2, w3, b3 = raw_params
    if repeat is not None:
        o_input = jnp.broadcast_to(
            jnp.expand_dims(o_input, 1),
            o_input.shape[:1] + (repeat,) + o_input.shape[1:])
    h1 = jnp.maximum(o_input @ w1 + b1, 0.0)
    h2 = jnp.maximum(h1 @ w2 + b2, 0.0)
    return jnp.tanh(h2 @ w3 + b3)


if __name__ == "__main__":
    key = jax.random.PRNGKey(0)
    k_params, k_obs, k_obs2, k_obs3 = jax.random.split(key, 4)

    # Small, module-consistent shapes.
    o_dim, a_dim, h_size = 16, 8, 32
    batch, n_rep = 2, 4

    raw_params = init_policy_params(k_params, o_dim, a_dim, h_size)
    kparams = prepare_kernel_params(raw_params)

    obs = jax.random.normal(k_obs, (batch, o_dim), jnp.float32)

    # Case 1: no repeat -> (batch, a_dim)
    act = jax.block_until_ready(policy_forward(kparams, obs))
    act_ref = policy_forward_ref(raw_params, obs)
    assert act.shape == (batch, a_dim), act.shape
    assert jnp.allclose(act, act_ref, atol=3e-2, rtol=3e-2), (act, act_ref)

    # Case 2: repeat -> (batch, repeat, a_dim), identical copies along dim 1
    act_r = jax.block_until_ready(policy_forward(kparams, obs, repeat=n_rep))
    act_r_ref = policy_forward_ref(raw_params, obs, repeat=n_rep)
    assert act_r.shape == (batch, n_rep, a_dim), act_r.shape
    assert jnp.allclose(act_r, act_r_ref, atol=3e-2, rtol=3e-2), (act_r, act_r_ref)
    assert jnp.allclose(act_r[:, 0, :], act, atol=1e-6)

    # Case 3: batch that is not 8/128 aligned (single exact-fit block)
    obs2 = jax.random.normal(k_obs2, (20, o_dim), jnp.float32)
    act2 = jax.block_until_ready(policy_forward(kparams, obs2))
    act2_ref = policy_forward_ref(raw_params, obs2)
    assert act2.shape == (20, a_dim), act2.shape
    assert jnp.allclose(act2, act2_ref, atol=3e-2, rtol=3e-2), (act2, act2_ref)

    # Case 4: multi-block grid with a ragged last block (cdiv grid, masked store)
    obs3 = jax.random.normal(k_obs3, (300, o_dim), jnp.float32)
    act3 = jax.block_until_ready(policy_forward(kparams, obs3, max_tile=128))
    act3_ref = policy_forward_ref(raw_params, obs3)
    assert act3.shape == (300, a_dim), act3.shape
    assert jnp.allclose(act3, act3_ref, atol=3e-2, rtol=3e-2), (act3, act3_ref)

    print("KERNEL_OK")
</pallas_src>

<mosaic_0001>
module attributes {stable_mosaic.version = 11 : i64} {
  func.func @_policy_kernel(%arg0: i32, %arg1: memref<2x16xf32, #tpu.memory_space<vmem>>, %arg2: memref<16x128xbf16, #tpu.memory_space<vmem>>, %arg3: memref<1x128xbf16, #tpu.memory_space<vmem>>, %arg4: memref<128x128xbf16, #tpu.memory_space<vmem>>, %arg5: memref<1x128xbf16, #tpu.memory_space<vmem>>, %arg6: memref<128x128xbf16, #tpu.memory_space<vmem>>, %arg7: memref<1x128xf32, #tpu.memory_space<vmem>>, %arg8: memref<2x8xf32, #tpu.memory_space<vmem>>) attributes {dimension_semantics = [#tpu.dimension_semantics<parallel>], iteration_bounds = array<i64: 1>, scalar_prefetch = 0 : i64, scratch_operands = 0 : i64, tpu.core_type = #tpu.core_type<tc>, window_params = [{transform_indices = @transform_0, window_bounds = array<i64: 2, 16>}, {pipeline_mode = #tpu.pipeline_mode<synchronous>, transform_indices = @transform_1, window_bounds = array<i64: 16, 128>}, {pipeline_mode = #tpu.pipeline_mode<synchronous>, transform_indices = @transform_2, window_bounds = array<i64: 1, 128>}, {pipeline_mode = #tpu.pipeline_mode<synchronous>, transform_indices = @transform_3, window_bounds = array<i64: 128, 128>}, {pipeline_mode = #tpu.pipeline_mode<synchronous>, transform_indices = @transform_4, window_bounds = array<i64: 1, 128>}, {pipeline_mode = #tpu.pipeline_mode<synchronous>, transform_indices = @transform_5, window_bounds = array<i64: 128, 128>}, {pipeline_mode = #tpu.pipeline_mode<synchronous>, transform_indices = @transform_6, window_bounds = array<i64: 1, 128>}, {transform_indices = @transform_7, window_bounds = array<i64: 2, 8>}]} {
    %c0 = arith.constant 0 : index
    %c0_0 = arith.constant 0 : index
    %0 = vector.load %arg1[%c0, %c0_0] : memref<2x16xf32, #tpu.memory_space<vmem>>, vector<2x16xf32>
    %1 = arith.truncf %0 : vector<2x16xf32> to vector<2x16xbf16>
    %c0_1 = arith.constant 0 : index
    %c0_2 = arith.constant 0 : index
    %2 = vector.load %arg2[%c0_1, %c0_2] : memref<16x128xbf16, #tpu.memory_space<vmem>>, vector<16x128xbf16>
    %cst = arith.constant dense<0.000000e+00> : vector<2x128xf32>
    %3 = tpu.matmul %1, %2, %cst {dimension_numbers = #tpu.dot_dimension_numbers<[1], [0], [0], [1], [0, 0, 1, 1], [], []>} : vector<2x16xbf16>, vector<16x128xbf16>, vector<2x128xf32> -> vector<2x128xf32>
    %4 = arith.truncf %3 : vector<2x128xf32> to vector<2x128xbf16>
    %c0_3 = arith.constant 0 : index
    %c0_4 = arith.constant 0 : index
    %5 = vector.load %arg3[%c0_3, %c0_4] : memref<1x128xbf16, #tpu.memory_space<vmem>>, vector<1x128xbf16>
    %6 = vector.broadcast %5 : vector<1x128xbf16> to vector<2x128xbf16>
    %7 = arith.addf %4, %6 : vector<2x128xbf16>
    %cst_5 = arith.constant 0.000000e+00 : bf16
    %8 = vector.broadcast %cst_5 : bf16 to vector<2x128xbf16>
    %9 = arith.maximumf %7, %8 : vector<2x128xbf16>
    %c0_6 = arith.constant 0 : index
    %c0_7 = arith.constant 0 : index
    %10 = vector.load %arg4[%c0_6, %c0_7] : memref<128x128xbf16, #tpu.memory_space<vmem>>, vector<128x128xbf16>
    %cst_8 = arith.constant dense<0.000000e+00> : vector<2x128xf32>
    %11 = tpu.matmul %9, %10, %cst_8 {dimension_numbers = #tpu.dot_dimension_numbers<[1], [0], [0], [1], [0, 0, 1, 1], [], []>} : vector<2x128xbf16>, vector<128x128xbf16>, vector<2x128xf32> -> vector<2x128xf32>
    %12 = arith.truncf %11 : vector<2x128xf32> to vector<2x128xbf16>
    %c0_9 = arith.constant 0 : index
    %c0_10 = arith.constant 0 : index
    %13 = vector.load %arg5[%c0_9, %c0_10] : memref<1x128xbf16, #tpu.memory_space<vmem>>, vector<1x128xbf16>
    %14 = vector.broadcast %13 : vector<1x128xbf16> to vector<2x128xbf16>
    %15 = arith.addf %12, %14 : vector<2x128xbf16>
    %cst_11 = arith.constant 0.000000e+00 : bf16
    %16 = vector.broadcast %cst_11 : bf16 to vector<2x128xbf16>
    %17 = arith.maximumf %15, %16 : vector<2x128xbf16>
    %c0_12 = arith.constant 0 : index
    %c0_13 = arith.constant 0 : index
    %18 = vector.load %arg6[%c0_12, %c0_13] : memref<128x128xbf16, #tpu.memory_space<vmem>>, vector<128x128xbf16>
    %cst_14 = arith.constant dense<0.000000e+00> : vector<2x128xf32>
    %19 = tpu.matmul %17, %18, %cst_14 {dimension_numbers = #tpu.dot_dimension_numbers<[1], [0], [0], [1], [0, 0, 1, 1], [], []>} : vector<2x128xbf16>, vector<128x128xbf16>, vector<2x128xf32> -> vector<2x128xf32>
    %c0_15 = arith.constant 0 : index
    %c0_16 = arith.constant 0 : index
    %20 = vector.load %arg7[%c0_15, %c0_16] : memref<1x128xf32, #tpu.memory_space<vmem>>, vector<1x128xf32>
    %21 = vector.broadcast %20 : vector<1x128xf32> to vector<2x128xf32>
    %22 = arith.addf %19, %21 : vector<2x128xf32>
    %23 = math.tanh %22 : vector<2x128xf32>
    %24 = vector.extract_strided_slice %23 {offsets = [0, 0], sizes = [2, 8], strides = [1, 1]} : vector<2x128xf32> to vector<2x8xf32>
    %c0_17 = arith.constant 0 : index
    %c0_18 = arith.constant 0 : index
    %25 = vector.load %arg8[%c0_17, %c0_18] : memref<2x8xf32, #tpu.memory_space<vmem>>, vector<2x8xf32>
    tpu.vector_store %arg8[%c0_17, %c0_18], %24 {strides = array<i32>} : memref<2x8xf32, #tpu.memory_space<vmem>>, vector<2x8xf32>,
    return
  }
  func.func @transform_0(%arg0: i32) -> (i32, i32) {
    %c0_i32 = arith.constant 0 : i32
    %c0_i32_0 = arith.constant 0 : i32
    return %arg0, %c0_i32 : i32, i32
  }
  func.func @transform_1(%arg0: i32) -> (i32, i32) {
    %c0_i32 = arith.constant 0 : i32
    %c0_i32_0 = arith.constant 0 : i32
    %c0_i32_1 = arith.constant 0 : i32
    return %c0_i32, %c0_i32_0 : i32, i32
  }
  func.func @transform_2(%arg0: i32) -> (i32, i32) {
    %c0_i32 = arith.constant 0 : i32
    %c0_i32_0 = arith.constant 0 : i32
    %c0_i32_1 = arith.constant 0 : i32
    return %c0_i32, %c0_i32_0 : i32, i32
  }
  func.func @transform_3(%arg0: i32) -> (i32, i32) {
    %c0_i32 = arith.constant 0 : i32
    %c0_i32_0 = arith.constant 0 : i32
    %c0_i32_1 = arith.constant 0 : i32
    return %c0_i32, %c0_i32_0 : i32, i32
  }
  func.func @transform_4(%arg0: i32) -> (i32, i32) {
    %c0_i32 = arith.constant 0 : i32
    %c0_i32_0 = arith.constant 0 : i32
    %c0_i32_1 = arith.constant 0 : i32
    return %c0_i32, %c0_i32_0 : i32, i32
  }
  func.func @transform_5(%arg0: i32) -> (i32, i32) {
    %c0_i32 = arith.constant 0 : i32
    %c0_i32_0 = arith.constant 0 : i32
    %c0_i32_1 = arith.constant 0 : i32
    return %c0_i32, %c0_i32_0 : i32, i32
  }
  func.func @transform_6(%arg0: i32) -> (i32, i32) {
    %c0_i32 = arith.constant 0 : i32
    %c0_i32_0 = arith.constant 0 : i32
    %c0_i32_1 = arith.constant 0 : i32
    return %c0_i32, %c0_i32_0 : i32, i32
  }
  func.func @transform_7(%arg0: i32) -> (i32, i32) {
    %c0_i32 = arith.constant 0 : i32
    %c0_i32_0 = arith.constant 0 : i32
    return %arg0, %c0_i32 : i32, i32
  }
}

</mosaic_0001>

<bundles_post_ra>
// kernel: tpu_custom_call.1
= control target key start
LH: loop header
LB: loop body
LE: loop exit
PB: predicated region body
PF: predicated region fallthrough
CT: control target
= control target key end

     0   :  { %12 = vsyncpa [#allocation3], 0  ;;  %s772_s0 = inlined_call_operand.hbm [shape: f32[2,16], index: 0, kind: input, shape index: {}]   ;;  %s773_s1 = inlined_call_operand.hbm [shape: bf16[16,128], index: 1, kind: input, shape index: {}]   ;;  %s774_s2 = inlined_call_operand.vmem [shape: bf16[1,128], index: 2, kind: input, shape index: {}]   ;;  %s775_s3 = inlined_call_operand.hbm [shape: bf16[128,128], index: 3, kind: input, shape index: {}]   ;;  %s776_s4 = inlined_call_operand.vmem [shape: bf16[1,128], index: 4, kind: input, shape index: {}]   ;;  %s777_s5 = inlined_call_operand.hbm [shape: bf16[128,128], index: 5, kind: input, shape index: {}]   ;;  %s778_s6 = inlined_call_operand.vmem [shape: f32[1,128], index: 6, kind: input, shape index: {}]   ;;  %s779_s7 = inlined_call_operand.hbm [shape: f32[2,8], index: 7, kind: output, shape index: {}]  }
   0x1   :  { %13 = vsyncpa [#allocation6], 0 }
   0x2   :  { %14 = vsyncpa [#allocation9], 0 }
   0x3   :  { %15 = vsyncpa [#allocation4], 0  ;;  %s624_s24 = smov [#allocation5]   ;;  %s506_s28 = scalar_lea.hbm %s773_s1, 128 }
   0x4   :  { %s31_s25 = sshll.u32 %s624_s24, 4  ;;  %p507_p0 = scmp.ne.s32.totalorder %s773_s1, %s506_s28  ;;  %s32_s25 = int_to_ptr.vmem [resolvable:$true] %s31_s25 }
   0x5   :  { %p510_p1 = scmp.lt.u32.totalorder %s506_s28, %s773_s1 }
   0x7   :  { %p512_p2 = pnand %p510_p1, %p507_p0 }
   0x9   :  { %515 = shalt.err (!%p512_p2)
}
   0xa   :  { %s516_s10 = scalar_lea.vmem %s32_s25, 128  ;;  %p521_p4 = scmp.lt.s32.totalorder %s32_s25, %s32_s25 }
   0xb   :  { %p517_p3 = scmp.ne.s32.totalorder %s32_s25, %s516_s10  ;;  %p522_p5 = scmp.lt.s32.totalorder %s516_s10, %s516_s10 }
   0xd   :  { %p523_p6 = por %p522_p5, %p521_p4 }
   0xf   :  { %p524_p7 = pnand %p523_p6, %p517_p3 }
  0x11   :  { %527 = shalt.err (!%p524_p7)
}
  0x12   :  { %s625_s11 = smov 64   ;;  %s626_s12 = smov 4  }
  0x13   :  { %37 = dma.hbm_to_vmem [thread:$0]  %s773_s1, 128, %s32_s25, [#allocation6], %s625_s11, %s625_s11, %s626_s12  }
  0x14   :  { %s627_s15 = smov [#allocation2]   ;;  %s628_s17 = smov [#allocation7]  }
  0x15   :  { %s22_s16 = sshll.u32 %s627_s15, 4  ;;  %s45_s18 = sshll.u32 %s628_s17, 4  ;;  %s23_s16 = int_to_ptr.vmem [resolvable:$true] %s22_s16  ;;  %s46_s18 = int_to_ptr.vmem [resolvable:$true] %s45_s18 }
  0x16   :  { %s528_s21 = scalar_lea.hbm %s772_s0, 32 }
  0x17   :  { %p529_p8 = scmp.ne.s32.totalorder %s772_s0, %s528_s21  ;;  %p532_p9 = scmp.lt.u32.totalorder %s528_s21, %s772_s0 }
  0x19   :  { %p534_p10 = pnand %p532_p9, %p529_p8 }
  0x1b   :  { %537 = shalt.err (!%p534_p10)
}
  0x1c   :  { %s538_s1 = scalar_lea.vmem %s23_s16, 32  ;;  %p543_p12 = scmp.lt.s32.totalorder %s23_s16, %s23_s16 }
  0x1d   :  { %p539_p11 = scmp.ne.s32.totalorder %s23_s16, %s538_s1  ;;  %p544_p13 = scmp.lt.s32.totalorder %s538_s1, %s538_s1 }
  0x1f   :  { %p545_p0 = por %p544_p13, %p543_p12 }
  0x21   :  { %p546_p1 = pnand %p545_p0, %p539_p11 }
  0x23   :  { %549 = shalt.err (!%p546_p1)
}
  0x24   :  { %25 = dma.hbm_to_vmem [thread:$0]  %s772_s0, 32, %s23_s16, [#allocation3]  }
  0x25   :  { %s550_s30 = scalar_lea.hbm %s775_s3, 1024 }
  0x26   :  { %p551_p2 = scmp.ne.s32.totalorder %s775_s3, %s550_s30  ;;  %p554_p3 = scmp.lt.u32.totalorder %s550_s30, %s775_s3 }
  0x28   :  { %p556_p4 = pnand %p554_p3, %p551_p2 }
  0x2a   :  { %559 = shalt.err (!%p556_p4)
}
  0x2b   :  { %s560_s14 = scalar_lea.vmem %s46_s18, 1024  ;;  %p565_p6 = scmp.lt.s32.totalorder %s46_s18, %s46_s18 }
  0x2c   :  { %p561_p5 = scmp.ne.s32.totalorder %s46_s18, %s560_s14  ;;  %p566_p7 = scmp.lt.s32.totalorder %s560_s14, %s560_s14 }
  0x2e   :  { %p567_p8 = por %p566_p7, %p565_p6 }
  0x30   :  { %p568_p9 = pnand %p567_p8, %p561_p5 }
  0x32   :  { %571 = shalt.err (!%p568_p9)
}
  0x33   :  { %51 = dma.hbm_to_vmem [thread:$0]  %s775_s3, 1024, %s46_s18, [#allocation6], %s625_s11, %s625_s11, %s626_s12  }
  0x34   :  { %s629_s16 = smov [#allocation8]   ;;  %s572_s21 = scalar_lea.hbm %s777_s5, 1024 }
  0x35   :  { %s59_s17 = sshll.u32 %s629_s16, 4  ;;  %p573_p10 = scmp.ne.s32.totalorder %s777_s5, %s572_s21  ;;  %s60_s17 = int_to_ptr.vmem [resolvable:$true] %s59_s17 }
  0x36   :  { %p576_p11 = scmp.lt.u32.totalorder %s572_s21, %s777_s5 }
  0x38   :  { %p578_p12 = pnand %p576_p11, %p573_p10 }
  0x3a   :  { %581 = shalt.err (!%p578_p12)
}
  0x3b   :  { %s582_s1 = scalar_lea.vmem %s60_s17, 1024  ;;  %p587_p0 = scmp.lt.s32.totalorder %s60_s17, %s60_s17 }
  0x3c   :  { %p583_p13 = scmp.ne.s32.totalorder %s60_s17, %s582_s1  ;;  %p588_p1 = scmp.lt.s32.totalorder %s582_s1, %s582_s1 }
  0x3e   :  { %p589_p2 = por %p588_p1, %p587_p0 }
  0x40   :  { %p590_p3 = pnand %p589_p2, %p583_p13 }
  0x42   :  { %593 = shalt.err (!%p590_p3)
}
  0x43   :  { %65 = dma.hbm_to_vmem [thread:$0]  %s777_s5, 1024, %s60_s17, [#allocation9], %s625_s11, %s625_s11, %s626_s12  }
  0x44   :  { %616 = dma.done.wait [#allocation3], 32  }
  0x45   :  { %617 = vsyncadd [#allocation3], 4294967264 }
  0x46   :  { %618 = dma.done.wait [#allocation6], 1152  }
  0x47   :  { %619 = vsyncadd [#allocation6], 4294966144 }
  0x48   :  { %620 = dma.done.wait [#allocation9], 1024  }
  0x49   :  { %621 = vsyncadd [#allocation9], 4294966272  ;;  %v630_v0 = vmov 0.0   ;;  %vm631_vm0 = vmmov 0   ;;  %v487_v1 = vld [vmem:[#allocation5] sm:$0xff]   ;;  %vm91_vm1 = vcmask 130048   ;;  %v140_v18 = vlaneseq }
  0x4a   :  { %431 = vmatprep.subr.bf16.mxu0 %v630_v0  ;;  %433 = vmatprep.mubr.msk.bf16.mxu0 %vm631_vm0, %v630_v0  ;;  %v81_v2 = vld [vmem:[#allocation2] sm:$0x3]  ;;  %v488_v4 = vld [vmem:[#allocation7] sm:$0xff]   ;;  %v489_v5 = vld [vmem:[#allocation7 + $0x8] sm:$0xff]   ;;  %v632_v30 = vmov 0   ;;  %vm373_vm2 = vcmask 58368  }
  0x4b   :  { %437 = vmatprep.subr.bf16.mxu1 %v630_v0  ;;  %453 = vmatprep.mubr.msk.bf16.mxu1 %vm631_vm0, %v630_v0  ;;  %v82_v3 = vpack.c.bf16 %v81_v2, %v81_v2  ;;  %v490_v6 = vld [vmem:[#allocation7 + $0x10] sm:$0xff]   ;;  %v491_v7 = vld [vmem:[#allocation7 + $0x18] sm:$0xff]   ;;  %v492_v8 = vld [vmem:[#allocation7 + $0x20] sm:$0xff]   ;;  %v141_v19 = vshrl.u32 %v140_v18, 7 }
  0x4c   :  { %432 = vmatpush3.bf16.msra.mxu0 %v487_v1  ;;  %438 = vmatpush3.bf16.msra.mxu1 %v488_v4  ;;  %v493_v9 = vld [vmem:[#allocation7 + $0x28] sm:$0xff]   ;;  %v494_v10 = vld [vmem:[#allocation7 + $0x30] sm:$0xff]   ;;  %v495_v11 = vld [vmem:[#allocation7 + $0x38] sm:$0xff]  }
  0x4d   :  { %457 = vmatprep.subr.bf16.mxu0 %v630_v0  ;;  %439 = vmatprep.subr.bf16.mxu1 %v630_v0  ;;  %v496_v12 = vld [vmem:[#allocation8] sm:$0xff]   ;;  %v497_v13 = vld [vmem:[#allocation8 + $0x8] sm:$0xff]   ;;  %v498_v14 = vld [vmem:[#allocation8 + $0x10] sm:$0xff]   ;;  %v142_v22 = vsub.s32 0, %v141_v19 }
  0x4e   :  { %v499_v15 = vld [vmem:[#allocation8 + $0x18] sm:$0xff]   ;;  %v500_v16 = vld [vmem:[#allocation8 + $0x20] sm:$0xff]   ;;  %v501_v17 = vld [vmem:[#allocation8 + $0x28] sm:$0xff]  }
  0x4f   :  { %434 = vmatmul.mubr.msk.bf16.vlgmr.msra.gmra.mrb[0].mxu0 %vm91_vm1, %v82_v3  ;;  %v136_v20 = vld [vmem:[%s774_s2] sm:$0x1]  ;;  %v503_v33 = vld [vmem:[#allocation8 + $0x38] sm:$0xff]  }
  0x50   :  { %473 = vmatprep.mubr.msk.bf16.mxu0 %vm631_vm0, %v630_v0  ;;  %440 = vmatpush3.bf16.msra.mxu1 %v489_v5  ;;  %v138_v21 = vpack.i.b16 %v136_v20, %v136_v20  ;;  %v502_v32 = vld [vmem:[#allocation8 + $0x30] sm:$0xff]  }
  0x51   :  { %441 = vmatprep.subr.bf16.mxu1 %v630_v0  ;;  %458 = vmatpush3.bf16.msra.mxu0 %v496_v12  ;;  %v251_v34 = vld [vmem:[%s776_s4] sm:$0x1]  ;;  %s633_s4 = smov [#allocation10]  }
  0x52   :  { %459 = vmatprep.subr.bf16.mxu0 %v630_v0  ;;  %v143_v23 = vrot.slane %v138_v21, %v142_v22  ;;  %v253_v35 = vpack.i.b16 %v251_v34, %v251_v34  ;;  %v402_v44 = vld [vmem:[%s778_s6] ss:$0 sm:$0xff]  ;;  %s381_s28 = sshll.u32 %s633_s4, 4  ;;  %s382_s28 = int_to_ptr.vmem [resolvable:$true] %s381_s28 }
  0x53   :  { %s594_s29 = scalar_lea.vmem %s382_s28, 32  ;;  %p599_p5 = scmp.lt.s32.totalorder %s382_s28, %s382_s28 }
  0x54   :  { %442 = vmatpush3.bf16.msra.mxu1 %v490_v6  ;;  %v258_v36 = vrot.slane %v253_v35, %v142_v22  ;;  %p595_p4 = scmp.ne.s32.totalorder %s382_s28, %s594_s29  ;;  %p600_p6 = scmp.lt.s32.totalorder %s594_s29, %s594_s29 }
  0x55   :  { %443 = vmatprep.subr.bf16.mxu1 %v630_v0  ;;  %460 = vmatpush3.bf16.msra.mxu0 %v497_v13 }
  0x56   :  { %461 = vmatprep.subr.bf16.mxu0 %v630_v0  ;;  %p601_p7 = por %p600_p6, %p599_p5 }
  0x58   :  { %444 = vmatpush3.bf16.msra.mxu1 %v491_v7  ;;  %p602_p8 = pnand %p601_p7, %p595_p4 }
  0x59   :  { %445 = vmatprep.subr.bf16.mxu1 %v630_v0  ;;  %462 = vmatpush3.bf16.msra.mxu0 %v498_v14 }
  0x5a   :  { %463 = vmatprep.subr.bf16.mxu0 %v630_v0 }
  0x5c   :  { %446 = vmatpush3.bf16.msra.mxu1 %v492_v8 }
  0x5d   :  { %447 = vmatprep.subr.bf16.mxu1 %v630_v0  ;;  %464 = vmatpush3.bf16.msra.mxu0 %v499_v15 }
  0x5e   :  { %465 = vmatprep.subr.bf16.mxu0 %v630_v0 }
  0x60   :  { %448 = vmatpush3.bf16.msra.mxu1 %v493_v9 }
  0x61   :  { %449 = vmatprep.subr.bf16.mxu1 %v630_v0  ;;  %466 = vmatpush3.bf16.msra.mxu0 %v500_v16 }
  0x62   :  { %467 = vmatprep.subr.bf16.mxu0 %v630_v0 }
  0x64   :  { %450 = vmatpush3.bf16.msra.mxu1 %v494_v10 }
  0x65   :  { %451 = vmatprep.subr.bf16.mxu1 %v630_v0  ;;  %468 = vmatpush3.bf16.msra.mxu0 %v501_v17 }
  0x66   :  { %469 = vmatprep.subr.bf16.mxu0 %v630_v0 }
  0x68   :  { %452 = vmatpush3.bf16.msra.mxu1 %v495_v11 }
  0x69   :  { %470 = vmatpush3.bf16.msra.mxu0 %v502_v32 }
  0x6a   :  { %471 = vmatprep.subr.bf16.mxu0 %v630_v0 }
  0x6d   :  { %472 = vmatpush3.bf16.msra.mxu0 %v503_v33 }
 0x122   :  { %v129_v24 = vpop.f32.mrb[0].mxu0 }
 0x123   :  { %v135_v25 = vpack.c.bf16 %v129_v24, %v129_v24  ;;  %v435_v26 = vpop.f32.mrb[1].mxu0 }
 0x124   :  { %v132_v27 = vpop.f32.mrb[2].mxu0 }
 0x125   :  { %v144_v28 = vadd.bf16 %v143_v23, %v135_v25  ;;  %v436_v29 = vpop.f32.mrb[3].mxu0 }
 0x127   :  { %v145_v31 = vmax.bf16 %v632_v30, %v144_v28 }
 0x129   :  { %454 = vmatmul.mubr.bf16.vlgmr.msra.gmra.mrb[0].mxu1 %v145_v31 }
 0x1fc   :  { %v244_v37 = vpop.f32.mrb[0].mxu1 }
 0x1fd   :  { %v250_v38 = vpack.c.bf16 %v244_v37, %v244_v37  ;;  %v455_v39 = vpop.f32.mrb[1].mxu1 }
 0x1fe   :  { %v247_v40 = vpop.f32.mrb[2].mxu1 }
 0x1ff   :  { %v259_v41 = vadd.bf16 %v258_v36, %v250_v38  ;;  %v456_v42 = vpop.f32.mrb[3].mxu1 }
 0x201   :  { %v260_v43 = vmax.bf16 %v632_v30, %v259_v41 }
 0x203   :  { %474 = vmatmul.mubr.bf16.vlgmr.msra.gmra.mrb[4].mxu0 %v260_v43 }
 0x2d6   :  { %v366_v45 = vpop.f32.mrb[4].mxu0 }
 0x2d7   :  { %v367_v46 = vadd.f32 %v402_v44, %v366_v45  ;;  %v475_v47 = vpop.f32.mrb[5].mxu0 }
 0x2d8   :  { %v369_v48 = vpop.f32.mrb[6].mxu0 }
 0x2d9   :  { %504 = vtanh.f32 %v367_v46  ;;  %v476_v49 = vpop.f32.mrb[7].mxu0 }
 0x2e3   :  { %v505_v50 = vpop.eup %504 }
 0x2e4   :  { %374 = vst.msk [vmem:[#allocation10] sm:$0x3] %vm373_vm2, %v505_v50 }
 0x2e5   :  { %605 = shalt.err (!%p602_p8)
}
 0x2e6   :  { %s606_s8 = scalar_lea.hbm %s779_s7, 32 }
 0x2e7   :  { %p607_p9 = scmp.ne.s32.totalorder %s779_s7, %s606_s8  ;;  %p610_p10 = scmp.lt.u32.totalorder %s606_s8, %s779_s7 }
 0x2e9   :  { %p612_p11 = pnand %p610_p10, %p607_p9 }
 0x2eb   :  { %615 = shalt.err (!%p612_p11)
}
 0x2ec   :  { %384 = dma.vmem_to_hbm [thread:$0]  %s382_s28, 32, %s779_s7, [#allocation4]  }
 0x2ed   :  { %622 = dma.done.wait [#allocation4], 32  }
 0x2ee   :  { %623 = vsyncadd [#allocation4], 4294967264 }
 0x2ef   :  { %388 = vsyncpa [#allocation3], 1 }
 0x2f0   :  { %389 = vsyncpa [#allocation6], 1 }
 0x2f1   :  { %390 = vsyncpa [#allocation9], 1 }
 0x2f2   :  { %391 = vsyncpa [#allocation4], 1 }

</bundles_post_ra>
